<compile_context>
chip_gen: v5e
topology: v5e:2x2
jax: 0.10.0
libtpu: 0.0.40
codegen_flags: <defaults>
</compile_context>

<pallas_src>
import functools

import numpy as np
import jax
import jax.numpy as jnp
from jax import lax
from jax.experimental import pallas as pl
from jax.experimental.pallas import tpu as pltpu


def _round_up(x, m):
    return ((x + m - 1) // m) * m


def _pdist_kernel(x_ref,      # VMEM (LN, d) f32  features, zero-padded rows (resident)
                  sqr_ref,    # VMEM (1, LN) f32  ||x_j||^2, j on lanes
                  sqc_ref,    # VMEM (LN, 1) f32  ||x_i||^2, i on sublanes
                  o_ref,      # VMEM (tm, LN) f32 distance rows for this tile
                  *, tm):
    i = pl.program_id(0)
    r0 = pl.multiple_of(i * tm, tm)                      # aligned sublane offset
    x_tile = x_ref[pl.ds(r0, tm), :]                     # (tm, d)  rows of this tile
    sq_tile = sqc_ref[pl.ds(r0, tm), :]                  # (tm, 1)

    # Gram tile on the MXU: x_tile @ x.T  -> (tm, LN)
    gram = lax.dot_general(
        x_tile, x_ref[...],
        dimension_numbers=(((1,), (1,)), ((), ())),
        preferred_element_type=jnp.float32)

    # dist = sqrt(clamp(||xi||^2 + ||xj||^2 - 2 xi.xj, 1e-12))  (matches torch)
    o_ref[...] = jnp.sqrt(jnp.maximum(sq_tile + sqr_ref[...] - 2.0 * gram, 1e-12))


def _pairwise_dist_padded(x):
    """Pallas kernel wrapper: (n, d) -> padded (LN, LN) distance matrix."""
    n, d = x.shape
    ln = _round_up(max(n, 1), 128)       # lane-dense column axis
    tm = 128                             # row tile (multiple of 8, divides ln)

    x_pad = jnp.zeros((ln, d), jnp.float32).at[:n, :].set(x)
    sq = jnp.sum(x_pad * x_pad, axis=1)
    sq_row = sq.reshape(1, ln)
    sq_col = sq.reshape(ln, 1)

    kernel = functools.partial(_pdist_kernel, tm=tm)
    dist = pl.pallas_call(
        kernel,
        out_shape=jax.ShapeDtypeStruct((ln, ln), jnp.float32),
        grid=(ln // tm,),
        in_specs=[
            pl.BlockSpec((ln, d), lambda i: (0, 0)),     # features (resident)
            pl.BlockSpec((1, ln), lambda i: (0, 0)),     # ||x||^2 on lanes
            pl.BlockSpec((ln, 1), lambda i: (0, 0)),     # ||x||^2 on sublanes
        ],
        out_specs=pl.BlockSpec((tm, ln), lambda i: (i, 0)),
        compiler_params=pltpu.CompilerParams(
            dimension_semantics=("parallel",)),
    )(x_pad, sq_row, sq_col)
    return dist, ln


def no_reduction_triplet_loss(inputs, targets, margin=0.3):
    """JAX/Pallas equivalent of NoReductionTripletLoss.forward.

    Returns a 1-D float32 array of per-triplet losses in the same lexicographic
    (anchor, positive, negative) order as the PyTorch triple loop; zeros(1) if
    no valid triplet exists.
    """
    inputs = jnp.asarray(inputs, dtype=jnp.float32)
    n = inputs.shape[0]

    # Dispatch the heavy Pallas work first (async) so it overlaps with the
    # host-side triplet-index construction below.
    dist_pad, ln = _pairwise_dist_padded(inputs)

    # TODO(synk): the triplet enumeration itself is inherently data-dependent
    # in shape (depends on label values), so it is built on host with numpy
    # (same as the reference's Python loop) instead of inside a Pallas kernel.
    t_host = np.asarray(jax.device_get(targets)).reshape(-1)
    ia_l, ip_l, ing_l = [], [], []
    for a in range(n):
        same = t_host == t_host[a]
        p_idx = np.nonzero(same)[0]
        ng_idx = np.nonzero(~same)[0]
        if ng_idx.size == 0:
            continue
        ia_l.append(np.full(p_idx.size * ng_idx.size, a, dtype=np.int32))
        ip_l.append(np.repeat(p_idx, ng_idx.size).astype(np.int32))
        ing_l.append(np.tile(ng_idx, p_idx.size).astype(np.int32))

    if not ia_l:
        return jnp.zeros((1,), dtype=jnp.float32)

    ia = jnp.asarray(np.concatenate(ia_l))
    ip = jnp.asarray(np.concatenate(ip_l))
    ing = jnp.asarray(np.concatenate(ing_l))

    d_ap = dist_pad[ia, ip]
    d_an = dist_pad[ia, ing]
    return jnp.maximum(d_ap - d_an + margin, 1e-12)


def _reference(inputs, targets, margin=0.3):
    # Pure-numpy reference mirroring the PyTorch code.
    x = np.asarray(inputs, dtype=np.float32)
    t = np.asarray(targets)
    n = x.shape[0]
    sq = (x ** 2).sum(axis=1, keepdims=True)
    dist = sq + sq.T - 2.0 * (x @ x.T)
    dist = np.sqrt(np.clip(dist, 1e-12, None))
    losses = []
    for a in range(n):
        for p in range(n):
            if t[a] != t[p]:
                continue
            for ng in range(n):
                if t[a] == t[ng]:
                    continue
                losses.append(np.clip(dist[a, p] - dist[a, ng] + margin, 1e-12, None))
    if losses:
        return np.stack(losses).astype(np.float32)
    return np.zeros((1,), dtype=np.float32)


if __name__ == "__main__":
    key = jax.random.PRNGKey(0)
    k1, k2 = jax.random.split(key)
    n, d = 8, 32
    inputs = jax.random.normal(k1, (n, d), dtype=jnp.float32)
    targets = jax.random.randint(k2, (n,), 0, 3, dtype=jnp.int32)

    losses = jax.block_until_ready(
        no_reduction_triplet_loss(inputs, targets, margin=0.3))

    ref = _reference(np.asarray(inputs), np.asarray(targets), margin=0.3)
    assert losses.shape == ref.shape, (losses.shape, ref.shape)
    np.testing.assert_allclose(np.asarray(losses), ref, rtol=1e-5, atol=1e-5)
    print("KERNEL_OK")
</pallas_src>

<mosaic_0001>
module attributes {stable_mosaic.version = 11 : i64} {
  func.func @_pdist_kernel(%arg0: i32, %arg1: memref<128x32xf32, #tpu.memory_space<vmem>>, %arg2: memref<1x128xf32, #tpu.memory_space<vmem>>, %arg3: memref<128x1xf32, #tpu.memory_space<vmem>>, %arg4: memref<128x128xf32, #tpu.memory_space<vmem>>) attributes {dimension_semantics = [#tpu.dimension_semantics<parallel>], iteration_bounds = array<i64: 1>, scalar_prefetch = 0 : i64, scratch_operands = 0 : i64, tpu.core_type = #tpu.core_type<tc>, window_params = [{pipeline_mode = #tpu.pipeline_mode<synchronous>, transform_indices = @transform_0, window_bounds = array<i64: 128, 32>}, {pipeline_mode = #tpu.pipeline_mode<synchronous>, transform_indices = @transform_1, window_bounds = array<i64: 1, 128>}, {pipeline_mode = #tpu.pipeline_mode<synchronous>, transform_indices = @transform_2, window_bounds = array<i64: 128, 1>}, {transform_indices = @transform_3, window_bounds = array<i64: 128, 128>}]} {
    %c128_i32 = arith.constant 128 : i32
    %0 = arith.muli %arg0, %c128_i32 : i32
    %1 = tpu.assume_multiple %0, 128 : i32
    %2 = arith.index_cast %1 : i32 to index
    %c0 = arith.constant 0 : index
    %3 = vector.load %arg1[%2, %c0] : memref<128x32xf32, #tpu.memory_space<vmem>>, vector<128x32xf32>
    %4 = arith.index_cast %1 : i32 to index
    %c0_0 = arith.constant 0 : index
    %5 = vector.load %arg3[%4, %c0_0] : memref<128x1xf32, #tpu.memory_space<vmem>>, vector<128x1xf32>
    %c0_1 = arith.constant 0 : index
    %c0_2 = arith.constant 0 : index
    %6 = vector.load %arg1[%c0_1, %c0_2] : memref<128x32xf32, #tpu.memory_space<vmem>>, vector<128x32xf32>
    %cst = arith.constant dense<0.000000e+00> : vector<128x128xf32>
    %7 = tpu.matmul %3, %6, %cst {dimension_numbers = #tpu.dot_dimension_numbers<[1], [1], [0], [0], [0, 0, 1, 0], [], []>} : vector<128x32xf32>, vector<128x32xf32>, vector<128x128xf32> -> vector<128x128xf32>
    %c0_3 = arith.constant 0 : index
    %c0_4 = arith.constant 0 : index
    %8 = vector.load %arg2[%c0_3, %c0_4] : memref<1x128xf32, #tpu.memory_space<vmem>>, vector<1x128xf32>
    %9 = vector.broadcast %5 : vector<128x1xf32> to vector<128x128xf32>
    %10 = vector.broadcast %8 : vector<1x128xf32> to vector<128x128xf32>
    %11 = arith.addf %9, %10 : vector<128x128xf32>
    %cst_5 = arith.constant 2.000000e+00 : f32
    %12 = vector.broadcast %cst_5 : f32 to vector<128x128xf32>
    %13 = arith.mulf %12, %7 : vector<128x128xf32>
    %14 = arith.subf %11, %13 : vector<128x128xf32>
    %cst_6 = arith.constant 9.99999996E-13 : f32
    %15 = vector.broadcast %cst_6 : f32 to vector<128x128xf32>
    %16 = arith.maximumf %14, %15 : vector<128x128xf32>
    %17 = math.sqrt %16 : vector<128x128xf32>
    %c0_7 = arith.constant 0 : index
    %c0_8 = arith.constant 0 : index
    %18 = vector.load %arg4[%c0_7, %c0_8] : memref<128x128xf32, #tpu.memory_space<vmem>>, vector<128x128xf32>
    tpu.vector_store %arg4[%c0_7, %c0_8], %17 {strides = array<i32>} : memref<128x128xf32, #tpu.memory_space<vmem>>, vector<128x128xf32>,
    return
  }
  func.func @transform_0(%arg0: i32) -> (i32, i32) {
    %c0_i32 = arith.constant 0 : i32
    %c0_i32_0 = arith.constant 0 : i32
    %c0_i32_1 = arith.constant 0 : i32
    return %c0_i32, %c0_i32_0 : i32, i32
  }
  func.func @transform_1(%arg0: i32) -> (i32, i32) {
    %c0_i32 = arith.constant 0 : i32
    %c0_i32_0 = arith.constant 0 : i32
    %c0_i32_1 = arith.constant 0 : i32
    return %c0_i32, %c0_i32_0 : i32, i32
  }
  func.func @transform_2(%arg0: i32) -> (i32, i32) {
    %c0_i32 = arith.constant 0 : i32
    %c0_i32_0 = arith.constant 0 : i32
    %c0_i32_1 = arith.constant 0 : i32
    return %c0_i32, %c0_i32_0 : i32, i32
  }
  func.func @transform_3(%arg0: i32) -> (i32, i32) {
    %c0_i32 = arith.constant 0 : i32
    %c0_i32_0 = arith.constant 0 : i32
    return %arg0, %c0_i32 : i32, i32
  }
}

</mosaic_0001>

<bundles_post_ra>
// kernel: tpu_custom_call.1
= control target key start
LH: loop header
LB: loop body
LE: loop exit
PB: predicated region body
PF: predicated region fallthrough
CT: control target
= control target key end

     0   :  { %vm66_vm0 = vcmask 261120   ;;  %v748_v3 = vmov 0   ;;  %s1220_s0 = inlined_call_operand.vmem [shape: f32[128,32], index: 0, kind: input, shape index: {}]   ;;  %s1221_s1 = inlined_call_operand.vmem [shape: f32[1,128], index: 1, kind: input, shape index: {}]   ;;  %s1222_s2 = inlined_call_operand.vmem [shape: f32[128,1], index: 2, kind: input, shape index: {}]   ;;  %s1223_s3 = inlined_call_operand.hbm [shape: f32[128,128], index: 3, kind: output, shape index: {}]  }
   0x1   :  { %v775_v0 = vld [vmem:[%s1220_s0 + $0x78] sm:$0xff]  ;;  %v788_v1 = vld [vmem:[%s1220_s0 + $0x70] sm:$0xff]  ;;  %v34_v2 = vld [vmem:[%s1222_s2] sm:$0xff]  ;;  %686 = vset.pattern.permute.xlu0 %v748_v3  ;;  %687 = vset.pattern.permute.xlu1 %v748_v3 }
   0x2   :  { %602 = vmatpush.xpose.msk.msra.mxu0 %vm66_vm0, %v775_v0  ;;  %634 = vmatpush.xpose.msk.msra.mxu1 %vm66_vm0, %v775_v0 }
   0x3   :  { %635 = vmatpush.xpose.msk.msra.mxu2 %vm66_vm0, %v775_v0  ;;  %636 = vmatpush.xpose.msk.msra.mxu3 %vm66_vm0, %v775_v0 }
   0x4   :  { %231 = vperm.xlu0 %686, %v34_v2   ;;  %688 = vset.pattern.permute.xlu2 %v748_v3 }
   0x5   :  { %8 = vsyncpa [#allocation3], 0  ;;  %v804_v4 = vld [vmem:[%s1220_s0 + $0x68] sm:$0xff]  ;;  %v36_v6 = vld [vmem:[%s1222_s2 + $0x10] sm:$0xff]  ;;  %s590_s25 = sshll.u32 %s1223_s3, 4  ;;  %s750_s26 = smov 128   ;;  %s591_s25 = int_to_ptr.hbm [resolvable:$true] %s590_s25 }
   0x6   :  { %603 = vmatpush.xpose.msk.msra.mxu0 %vm66_vm0, %v788_v1  ;;  %637 = vmatpush.xpose.msk.msra.mxu1 %vm66_vm0, %v788_v1  ;;  %v35_v5 = vld [vmem:[%s1222_s2 + $0x8] sm:$0xff]  ;;  %v823_v7 = vld [vmem:[%s1220_s0 + $0x60] sm:$0xff]  ;;  %v836_v8 = vld [vmem:[%s1220_s0 + $0x58] sm:$0xff]  ;;  %s751_s27 = smov 8  }
   0x7   :  { %638 = vmatpush.xpose.msk.msra.mxu2 %vm66_vm0, %v788_v1  ;;  %639 = vmatpush.xpose.msk.msra.mxu3 %vm66_vm0, %v788_v1  ;;  %v40_v9 = vld [vmem:[%s1222_s2 + $0x30] sm:$0xff]  ;;  %v37_v10 = vld [vmem:[%s1222_s2 + $0x18] sm:$0xff]  ;;  %v868_v12 = vld [vmem:[%s1220_s0 + $0x48] sm:$0xff] }
   0x8   :  { %241 = vperm.xlu1 %687, %v36_v6   ;;  %v855_v11 = vld [vmem:[%s1220_s0 + $0x50] sm:$0xff]  ;;  %v43_v13 = vld [vmem:[%s1222_s2 + $0x48] sm:$0xff]  ;;  %v41_v14 = vld [vmem:[%s1222_s2 + $0x38] sm:$0xff] }
   0x9   :  { %v887_v15 = vld [vmem:[%s1220_s0 + $0x40] sm:$0xff]  ;;  %v900_v16 = vld [vmem:[%s1220_s0 + $0x38] sm:$0xff]  ;;  %v44_v19 = vld [vmem:[%s1222_s2 + $0x50] sm:$0xff] }
   0xa   :  { %604 = vmatpush.xpose.msk.msra.mxu0 %vm66_vm0, %v804_v4  ;;  %640 = vmatpush.xpose.msk.msra.mxu1 %vm66_vm0, %v804_v4  ;;  %v46_v17 = vld [vmem:[%s1222_s2 + $0x60] sm:$0xff]  ;;  %v56_v20 = vld [vmem:[%s1220_s0 + $0x30] sm:$0xff]  ;;  %v55_v21 = vld [vmem:[%s1220_s0 + $0x28] sm:$0xff] }
   0xb   :  { %641 = vmatpush.xpose.msk.msra.mxu2 %vm66_vm0, %v804_v4  ;;  %642 = vmatpush.xpose.msk.msra.mxu3 %vm66_vm0, %v804_v4  ;;  %v38_v18 = vld [vmem:[%s1222_s2 + $0x20] sm:$0xff]  ;;  %v49_v22 = vld [vmem:[%s1222_s2 + $0x78] sm:$0xff]  ;;  %v39_v23 = vld [vmem:[%s1222_s2 + $0x28] sm:$0xff] }
   0xc   :  { %236 = vperm.xlu0 %686, %v35_v5   ;;  %251 = vperm.xlu2 %688, %v38_v18   ;;  %v47_v24 = vld [vmem:[%s1222_s2 + $0x68] sm:$0xff]  ;;  %v54_v25 = vld [vmem:[%s1220_s0 + $0x20] sm:$0xff]  ;;  %v53_v26 = vld [vmem:[%s1220_s0 + $0x18] sm:$0xff] }
   0xd   :  { %v42_v27 = vld [vmem:[%s1222_s2 + $0x40] sm:$0xff]  ;;  %v52_v28 = vld [vmem:[%s1220_s0 + $0x10] sm:$0xff]  ;;  %v51_v29 = vld [vmem:[%s1220_s0 + $0x8] sm:$0xff] }
   0xe   :  { %605 = vmatpush.xpose.msk.msra.mxu0 %vm66_vm0, %v823_v7  ;;  %643 = vmatpush.xpose.msk.msra.mxu1 %vm66_vm0, %v823_v7  ;;  %v45_v30 = vld [vmem:[%s1222_s2 + $0x58] sm:$0xff]  ;;  %v50_v31 = vld [vmem:[%s1220_s0] sm:$0xff]  ;;  %v48_v32 = vld [vmem:[%s1222_s2 + $0x70] sm:$0xff] }
   0xf   :  { %644 = vmatpush.xpose.msk.msra.mxu2 %vm66_vm0, %v823_v7  ;;  %645 = vmatpush.xpose.msk.msra.mxu3 %vm66_vm0, %v823_v7  ;;  %v1014_v42 = vld [vmem:[%s1221_s1] ss:$0 sm:$0xff]  ;;  %s749_s1 = smov [#allocation2]  }
  0x10   :  { %246 = vperm.xlu1 %687, %v37_v10   ;;  %s588_s22 = sshll.u32 %s749_s1, 4  ;;  %s589_s22 = int_to_ptr.vmem [resolvable:$true] %s588_s22 }
  0x12   :  { %606 = vmatpush.xpose.msk.msra.mxu0 %vm66_vm0, %v836_v8  ;;  %646 = vmatpush.xpose.msk.msra.mxu1 %vm66_vm0, %v836_v8 }
  0x13   :  { %647 = vmatpush.xpose.msk.msra.mxu2 %vm66_vm0, %v836_v8  ;;  %648 = vmatpush.xpose.msk.msra.mxu3 %vm66_vm0, %v836_v8 }
  0x14   :  { %261 = vperm.xlu0 %686, %v40_v9   ;;  %256 = vperm.xlu2 %688, %v39_v23  }
  0x16   :  { %607 = vmatpush.xpose.msk.msra.mxu0 %vm66_vm0, %v855_v11  ;;  %649 = vmatpush.xpose.msk.msra.mxu1 %vm66_vm0, %v855_v11 }
  0x17   :  { %650 = vmatpush.xpose.msk.msra.mxu2 %vm66_vm0, %v855_v11  ;;  %651 = vmatpush.xpose.msk.msra.mxu3 %vm66_vm0, %v855_v11 }
  0x18   :  { %266 = vperm.xlu1 %687, %v41_v14  }
  0x1a   :  { %608 = vmatpush.xpose.msk.msra.mxu0 %vm66_vm0, %v868_v12  ;;  %652 = vmatpush.xpose.msk.msra.mxu1 %vm66_vm0, %v868_v12 }
  0x1b   :  { %653 = vmatpush.xpose.msk.msra.mxu2 %vm66_vm0, %v868_v12  ;;  %654 = vmatpush.xpose.msk.msra.mxu3 %vm66_vm0, %v868_v12 }
  0x1c   :  { %276 = vperm.xlu0 %686, %v43_v13   ;;  %271 = vperm.xlu2 %688, %v42_v27  }
  0x1e   :  { %609 = vmatpush.xpose.msk.msra.mxu0 %vm66_vm0, %v887_v15  ;;  %655 = vmatpush.xpose.msk.msra.mxu1 %vm66_vm0, %v887_v15 }
  0x1f   :  { %656 = vmatpush.xpose.msk.msra.mxu2 %vm66_vm0, %v887_v15  ;;  %657 = vmatpush.xpose.msk.msra.mxu3 %vm66_vm0, %v887_v15 }
  0x20   :  { %281 = vperm.xlu1 %687, %v44_v19  }
  0x22   :  { %610 = vmatpush.xpose.msk.msra.mxu0 %vm66_vm0, %v900_v16  ;;  %658 = vmatpush.xpose.msk.msra.mxu1 %vm66_vm0, %v900_v16 }
  0x23   :  { %659 = vmatpush.xpose.msk.msra.mxu2 %vm66_vm0, %v900_v16  ;;  %660 = vmatpush.xpose.msk.msra.mxu3 %vm66_vm0, %v900_v16 }
  0x24   :  { %291 = vperm.xlu0 %686, %v46_v17   ;;  %286 = vperm.xlu2 %688, %v45_v30  }
  0x26   :  { %611 = vmatpush.xpose.msk.msra.mxu0 %vm66_vm0, %v56_v20  ;;  %661 = vmatpush.xpose.msk.msra.mxu1 %vm66_vm0, %v56_v20 }
  0x27   :  { %662 = vmatpush.xpose.msk.msra.mxu2 %vm66_vm0, %v56_v20  ;;  %663 = vmatpush.xpose.msk.msra.mxu3 %vm66_vm0, %v56_v20 }
  0x28   :  { %296 = vperm.xlu1 %687, %v47_v24  }
  0x2a   :  { %612 = vmatpush.xpose.msk.msra.mxu0 %vm66_vm0, %v55_v21  ;;  %664 = vmatpush.xpose.msk.msra.mxu1 %vm66_vm0, %v55_v21 }
  0x2b   :  { %665 = vmatpush.xpose.msk.msra.mxu2 %vm66_vm0, %v55_v21  ;;  %666 = vmatpush.xpose.msk.msra.mxu3 %vm66_vm0, %v55_v21 }
  0x2c   :  { %306 = vperm.xlu0 %686, %v49_v22   ;;  %301 = vperm.xlu2 %688, %v48_v32  }
  0x2e   :  { %613 = vmatpush.xpose.msk.msra.mxu0 %vm66_vm0, %v54_v25  ;;  %667 = vmatpush.xpose.msk.msra.mxu1 %vm66_vm0, %v54_v25 }
  0x2f   :  { %668 = vmatpush.xpose.msk.msra.mxu2 %vm66_vm0, %v54_v25  ;;  %669 = vmatpush.xpose.msk.msra.mxu3 %vm66_vm0, %v54_v25 }
  0x32   :  { %614 = vmatpush.xpose.msk.msra.mxu0 %vm66_vm0, %v53_v26  ;;  %670 = vmatpush.xpose.msk.msra.mxu1 %vm66_vm0, %v53_v26 }
  0x33   :  { %671 = vmatpush.xpose.msk.msra.mxu2 %vm66_vm0, %v53_v26  ;;  %672 = vmatpush.xpose.msk.msra.mxu3 %vm66_vm0, %v53_v26 }
  0x36   :  { %615 = vmatpush.xpose.msk.msra.mxu0 %vm66_vm0, %v52_v28  ;;  %673 = vmatpush.xpose.msk.msra.mxu1 %vm66_vm0, %v52_v28 }
  0x37   :  { %674 = vmatpush.xpose.msk.msra.mxu2 %vm66_vm0, %v52_v28  ;;  %675 = vmatpush.xpose.msk.msra.mxu3 %vm66_vm0, %v52_v28 }
  0x3a   :  { %616 = vmatpush.xpose.msk.msra.mxu0 %vm66_vm0, %v51_v29  ;;  %676 = vmatpush.xpose.msk.msra.mxu1 %vm66_vm0, %v51_v29 }
  0x3b   :  { %677 = vmatpush.xpose.msk.msra.mxu2 %vm66_vm0, %v51_v29  ;;  %678 = vmatpush.xpose.msk.msra.mxu3 %vm66_vm0, %v51_v29 }
  0x3e   :  { %617 = vmatpush.xpose.msk.msra.mxu0 %vm66_vm0, %v50_v31  ;;  %679 = vmatpush.xpose.msk.msra.mxu1 %vm66_vm0, %v50_v31 }
  0x3f   :  { %680 = vmatpush.xpose.msk.msra.mxu2 %vm66_vm0, %v50_v31  ;;  %681 = vmatpush.xpose.msk.msra.mxu3 %vm66_vm0, %v50_v31 }
  0x41   :  { %618 = vmatmul.msk.f32.vlgmr.msra.gmra.mxu0 %vm66_vm0, %v50_v31  ;;  %622 = vmatmul.msk.f32.vlgmr.msra.gmra.mxu1 %vm66_vm0, %v54_v25 }
  0x42   :  { %626 = vmatmul.msk.f32.vlgmr.msra.gmra.mxu2 %vm66_vm0, %v887_v15  ;;  %630 = vmatmul.msk.f32.vlgmr.msra.gmra.mxu3 %vm66_vm0, %v823_v7 }
  0x49   :  { %619 = vmatmul.msk.f32.gmra.mxu0 %vm66_vm0, %v51_v29  ;;  %623 = vmatmul.msk.f32.gmra.mxu1 %vm66_vm0, %v55_v21 }
  0x4a   :  { %627 = vmatmul.msk.f32.gmra.mxu2 %vm66_vm0, %v868_v12  ;;  %631 = vmatmul.msk.f32.gmra.mxu3 %vm66_vm0, %v804_v4 }
  0x51   :  { %620 = vmatmul.msk.f32.gmra.mxu0 %vm66_vm0, %v52_v28  ;;  %624 = vmatmul.msk.f32.gmra.mxu1 %vm66_vm0, %v56_v20 }
  0x52   :  { %628 = vmatmul.msk.f32.gmra.mxu2 %vm66_vm0, %v855_v11  ;;  %632 = vmatmul.msk.f32.gmra.mxu3 %vm66_vm0, %v788_v1 }
  0x59   :  { %621 = vmatmul.msk.f32.gmra.mxu0 %vm66_vm0, %v53_v26  ;;  %625 = vmatmul.msk.f32.gmra.mxu1 %vm66_vm0, %v900_v16 }
  0x5a   :  { %629 = vmatmul.msk.f32.gmra.mxu2 %vm66_vm0, %v836_v8  ;;  %633 = vmatmul.msk.f32.gmra.mxu3 %vm66_vm0, %v775_v0 }
  0x66   :  { %v252_v37 = vpop.permute.xlu2 %251 }
  0x67   :  { %v316_v46 = vadd.f32 %v1014_v42, %v252_v37 }
  0x6e   :  { %v257_v40 = vpop.permute.xlu2 %256 }
  0x6f   :  { %v317_v59 = vadd.f32 %v1014_v42, %v257_v40 }
  0x76   :  { %v232_v33 = vpop.permute.xlu0 %231  ;;  %v272_v54 = vpop.permute.xlu2 %271 }
  0x77   :  { %v312_v45 = vadd.f32 %v1014_v42, %v232_v33  ;;  %v320_v60 = vadd.f32 %v1014_v42, %v272_v54 }
  0x7a   :  { %v242_v34 = vpop.permute.xlu1 %241 }
  0x7b   :  { %v314_v13 = vadd.f32 %v1014_v42, %v242_v34 }
  0x7e   :  { %v237_v35 = vpop.permute.xlu0 %236  ;;  %v287_v21 = vpop.permute.xlu2 %286 }
  0x7f   :  { %v313_v56 = vadd.f32 %v1014_v42, %v237_v35  ;;  %v1052_v24 = vadd.f32 %v1014_v42, %v287_v21 }
  0x82   :  { %v247_v36 = vpop.permute.xlu1 %246 }
  0x83   :  { %v1037_v15 = vadd.f32 %v1014_v42, %v247_v36 }
  0x86   :  { %v262_v38 = vpop.permute.xlu0 %261 }
  0x87   :  { %v1044_v19 = vadd.f32 %v1014_v42, %v262_v38 }
  0x8a   :  { %v267_v39 = vpop.permute.xlu1 %266 }
  0x8b   :  { %v1047_v20 = vadd.f32 %v1014_v42, %v267_v39 }
  0x8e   :  { %v277_v41 = vpop.permute.xlu0 %276 }
  0x8f   :  { %v321_v23 = vadd.f32 %v1014_v42, %v277_v41 }
  0x92   :  { %v282_v51 = vpop.permute.xlu1 %281 }
  0x93   :  { %v1056_v28 = vadd.f32 %v1014_v42, %v282_v51 }
  0x96   :  { %v292_v55 = vpop.permute.xlu0 %291 }
  0x97   :  { %v324_v61 = vadd.f32 %v1014_v42, %v292_v55 }
  0x9a   :  { %v297_v16 = vpop.permute.xlu1 %296 }
  0x9b   :  { %v325_v29 = vadd.f32 %v1014_v42, %v297_v16 }
  0xbe   :  { %v180_v43 = vpop.f32.mrf.mxu0  ;;  %v192_v44 = vpop.f32.mrf.mxu1 }
  0xbf   :  { %v328_v47 = vmul.f32 2.0, %v180_v43  ;;  %v332_v48 = vmul.f32 2.0, %v192_v44 }
  0xc1   :  { %v344_v49 = vsub.f32 %v312_v45, %v328_v47  ;;  %v348_v50 = vsub.f32 %v316_v46, %v332_v48 }
  0xc3   :  { %v1018_v52 = vmax.f32 %v344_v49, 1e-12  ;;  %v1020_v53 = vmax.f32 %v348_v50, 1e-12 }
  0xc5   :  { %690 = vrsqrt.f32 %v1018_v52  ;;  %v204_v57 = vpop.f32.mrf.mxu2  ;;  %v216_v58 = vpop.f32.mrf.mxu3  ;;  %vm383_vm1 = vcmp.eq.f32.partialorder %v1018_v52, inf  ;;  %vm385_vm2 = vcmp.eq.f32.partialorder %v1018_v52, 0.0  ;;  %v386_v32 = vand.u32 2147483648, %v1018_v52 }
  0xc6   :  { %692 = vrsqrt.f32 %v1020_v53  ;;  %v183_v62 = vpop.f32.mrf.mxu0  ;;  %v195_v63 = vpop.f32.mrf.mxu1  ;;  %v336_v0 = vmul.f32 2.0, %v204_v57  ;;  %v340_v1 = vmul.f32 2.0, %v216_v58  ;;  %vm431_vm3 = vcmp.eq.f32.partialorder %v1020_v53, inf }
  0xc7   :  { %v329_v2 = vmul.f32 2.0, %v183_v62  ;;  %v333_v3 = vmul.f32 2.0, %v195_v63  ;;  %vm433_vm4 = vcmp.eq.f32.partialorder %v1020_v53, 0.0  ;;  %v434_v40 = vand.u32 2147483648, %v1020_v53 }
  0xc8   :  { %v352_v4 = vsub.f32 %v320_v60, %v336_v0  ;;  %v356_v5 = vsub.f32 %v324_v61, %v340_v1 }
  0xc9   :  { %v345_v6 = vsub.f32 %v313_v56, %v329_v2  ;;  %v349_v7 = vsub.f32 %v317_v59, %v333_v3 }
  0xca   :  { %v1028_v9 = vmax.f32 %v352_v4, 1e-12  ;;  %v1030_v10 = vmax.f32 %v356_v5, 1e-12 }
  0xcb   :  { %v691_v8 = vpop.eup %690  ;;  %v1032_v11 = vmax.f32 %v345_v6, 1e-12  ;;  %v1041_v18 = vmax.f32 %v349_v7, 1e-12 }
  0xcc   :  { %v693_v12 = vpop.eup %692  ;;  %v377_v14 = vmul.f32 %v691_v8, %v1018_v52  ;;  %694 = vrsqrt.f32 %v1028_v9  ;;  %vm479_vm5 = vcmp.eq.f32.partialorder %v1028_v9, inf  ;;  %vm481_vm6 = vcmp.eq.f32.partialorder %v1028_v9, 0.0 }
  0xcd   :  { %v425_v17 = vmul.f32 %v693_v12, %v1020_v53  ;;  %696 = vrsqrt.f32 %v1030_v10  ;;  %v207_v26 = vpop.f32.mrf.mxu2  ;;  %v219_v27 = vpop.f32.mrf.mxu3  ;;  %vm527_vm7 = vcmp.eq.f32.partialorder %v1030_v10, inf  ;;  %vm529_vm8 = vcmp.eq.f32.partialorder %v1030_v10, 0.0 }
  0xce   :  { %v378_v22 = vmul.f32 %v691_v8, %v377_v14  ;;  %698 = vrsqrt.f32 %v1032_v11  ;;  %v186_v31 = vpop.f32.mrf.mxu0  ;;  %v337_v35 = vmul.f32 2.0, %v207_v26  ;;  %v341_v36 = vmul.f32 2.0, %v219_v27  ;;  %v198_v37 = vpop.f32.mrf.mxu1 }
  0xcf   :  { %v426_v25 = vmul.f32 %v693_v12, %v425_v17  ;;  %700 = vrsqrt.f32 %v1041_v18  ;;  %v330_v41 = vmul.f32 2.0, %v186_v31  ;;  %v334_v54 = vmul.f32 2.0, %v198_v37 }
  0xd0   :  { %v379_v30 = vmul.f32 0.5, %v378_v22  ;;  %v353_v46 = vsub.f32 %v321_v23, %v337_v35  ;;  %v357_v47 = vsub.f32 %v325_v29, %v341_v36  ;;  %v482_v14 = vand.u32 2147483648, %v1028_v9  ;;  %v302_v36 = vpop.permute.xlu2 %301 }
  0xd1   :  { %v427_v33 = vmul.f32 0.5, %v426_v25  ;;  %v346_v51 = vsub.f32 %v314_v13, %v330_v41  ;;  %vm395_vm9 = vcmp.eq.f32.partialorder %v1032_v11, inf  ;;  %v350_v23 = vsub.f32 %v1044_v19, %v334_v54 }
  0xd2   :  { %v380_v34 = vsub.f32 1.5, %v379_v30  ;;  %v695_v38 = vpop.eup %694  ;;  %v1070_v58 = vmax.f32 %v353_v46, 1e-12  ;;  %v1074_v62 = vmax.f32 %v357_v47, 1e-12  ;;  %vm397_vm10 = vcmp.eq.f32.partialorder %v1032_v11, 0.0 }
  0xd3   :  { %v428_v39 = vsub.f32 1.5, %v427_v33  ;;  %v697_v43 = vpop.eup %696  ;;  %v473_v45 = vmul.f32 %v695_v38, %v1028_v9  ;;  %v1076_v63 = vmax.f32 %v346_v51, 1e-12  ;;  %vm443_vm11 = vcmp.eq.f32.partialorder %v1041_v18, inf }
  0xd4   :  { %v381_v44 = vmul.f32 %v691_v8, %v380_v34  ;;  %v699_v48 = vpop.eup %698  ;;  %v521_v50 = vmul.f32 %v697_v43, %v1030_v10  ;;  %702 = vrsqrt.f32 %v1070_v58  ;;  %v326_v54 = vadd.f32 %v1014_v42, %v302_v36 }
  0xd5   :  { %v429_v49 = vmul.f32 %v693_v12, %v428_v39  ;;  %v474_v56 = vmul.f32 %v695_v38, %v473_v45  ;;  %v389_v57 = vmul.f32 %v699_v48, %v1032_v11  ;;  %v701_v59 = vpop.eup %700  ;;  %704 = vrsqrt.f32 %v1074_v62  ;;  %v210_v25 = vpop.f32.mrf.mxu2 }
  0xd6   :  { %v382_v55 = vmul.f32 %v381_v44, %v1018_v52  ;;  %v522_v61 = vmul.f32 %v697_v43, %v521_v50  ;;  %v437_v3 = vmul.f32 %v701_v59, %v1041_v18  ;;  %706 = vrsqrt.f32 %v1076_v63  ;;  %v222_v46 = vpop.f32.mrf.mxu3  ;;  %v201_v50 = vpop.f32.mrf.mxu1 }
  0xd7   :  { %v430_v60 = vmul.f32 %v429_v49, %v1020_v53  ;;  %v475_v1 = vmul.f32 0.5, %v474_v56  ;;  %v390_v2 = vmul.f32 %v699_v48, %v389_v57  ;;  %v1114_v39 = vmax.f32 %v350_v23, 1e-12 }
  0xd8   :  { %v384_v0 = vsel %vm383_vm1, %v1018_v52, %v382_v55  ;;  %v523_v6 = vmul.f32 0.5, %v522_v61  ;;  %v438_v13 = vmul.f32 %v701_v59, %v437_v3  ;;  %vm445_vm12 = vcmp.eq.f32.partialorder %v1041_v18, 0.0 }
  0xd9   :  { %v387_v4 = vsel %vm385_vm2, %v386_v32, %v384_v0  ;;  %v432_v5 = vsel %vm431_vm3, %v1020_v53, %v430_v60  ;;  %v476_v8 = vsub.f32 1.5, %v475_v1  ;;  %v391_v12 = vmul.f32 0.5, %v390_v2 }
  0xda   :  { %568 = vst [vmem:[#allocation2] sm:$0xff] %v387_v4  ;;  %v435_v7 = vsel %vm433_vm4, %v434_v40, %v432_v5  ;;  %v524_v16 = vsub.f32 1.5, %v523_v6  ;;  %v439_v21 = vmul.f32 0.5, %v438_v13  ;;  %v530_v53 = vand.u32 2147483648, %v1030_v10  ;;  %v703_v30 = vpop.eup %702 }
  0xdb   :  { %572 = vst [vmem:[#allocation2 + $0x20] sm:$0xff] %v435_v7  ;;  %v477_v52 = vmul.f32 %v695_v38, %v476_v8  ;;  %v392_v17 = vsub.f32 1.5, %v391_v12  ;;  %v398_v32 = vand.u32 2147483648, %v1032_v11  ;;  %v485_v35 = vmul.f32 %v703_v30, %v1070_v58  ;;  %v705_v41 = vpop.eup %704 }
  0xdc   :  { %v525_v22 = vmul.f32 %v697_v43, %v524_v16  ;;  %v440_v29 = vsub.f32 1.5, %v439_v21  ;;  %v338_v40 = vmul.f32 2.0, %v210_v25  ;;  %v533_v49 = vmul.f32 %v705_v41, %v1074_v62  ;;  %v707_v51 = vpop.eup %706 }
  0xdd   :  { %v478_v26 = vmul.f32 %v477_v52, %v1028_v9  ;;  %v393_v27 = vmul.f32 %v699_v48, %v392_v17  ;;  %v446_v48 = vand.u32 2147483648, %v1041_v18  ;;  %708 = vrsqrt.f32 %v1114_v39  ;;  %v213_v6 = vpop.f32.mrf.mxu2 }
  0xde   :  { %v526_v31 = vmul.f32 %v525_v22, %v1030_v10  ;;  %v441_v34 = vmul.f32 %v701_v59, %v440_v29  ;;  %v534_v57 = vmul.f32 %v705_v41, %v533_v49  ;;  %v401_v59 = vmul.f32 %v707_v51, %v1076_v63 }
  0xdf   :  { %v480_v19 = vsel %vm479_vm5, %v1028_v9, %v478_v26  ;;  %v394_v33 = vmul.f32 %v393_v27, %v1032_v11  ;;  %v486_v9 = vmul.f32 %v703_v30, %v485_v35  ;;  %v354_v60 = vsub.f32 %v1056_v28, %v338_v40  ;;  %v225_v40 = vpop.f32.mrf.mxu3 }
  0xe0   :  { %v483_v37 = vsel %vm481_vm6, %v482_v14, %v480_v19  ;;  %v528_v38 = vsel %vm527_vm7, %v1030_v10, %v526_v31  ;;  %v442_v45 = vmul.f32 %v441_v34, %v1041_v18  ;;  %v189_v10 = vpop.f32.mrf.mxu0  ;;  %v342_v0 = vmul.f32 2.0, %v222_v46 }
  0xe1   :  { %576 = vst [vmem:[#allocation2 + $0x40] sm:$0xff] %v483_v37  ;;  %v531_v43 = vsel %vm529_vm8, %v530_v53, %v528_v38  ;;  %v396_v44 = vsel %vm395_vm9, %v1032_v11, %v394_v33  ;;  %v487_v11 = vmul.f32 0.5, %v486_v9  ;;  %v331_v1 = vmul.f32 2.0, %v189_v10 }
  0xe2   :  { %580 = vst [vmem:[#allocation2 + $0x60] sm:$0xff] %v531_v43  ;;  %v399_v47 = vsel %vm397_vm10, %v398_v32, %v396_v44  ;;  %v444_v55 = vsel %vm443_vm11, %v1041_v18, %v442_v45  ;;  %v335_v2 = vmul.f32 2.0, %v201_v50  ;;  %vm491_vm13 = vcmp.eq.f32.partialorder %v1070_v58, inf }
  0xe3   :  { %569 = vst [vmem:[#allocation2 + $0x8] sm:$0xff] %v399_v47  ;;  %v447_v56 = vsel %vm445_vm12, %v446_v48, %v444_v55  ;;  %v488_v61 = vsub.f32 1.5, %v487_v11  ;;  %v535_v3 = vmul.f32 0.5, %v534_v57  ;;  %v402_v4 = vmul.f32 %v707_v51, %v401_v59  ;;  %v709_v13 = vpop.eup %708 }
  0xe4   :  { %573 = vst [vmem:[#allocation2 + $0x28] sm:$0xff] %v447_v56  ;;  %v1135_v5 = vmax.f32 %v354_v60, 1e-12  ;;  %v358_v7 = vsub.f32 %v326_v54, %v342_v0  ;;  %v347_v8 = vsub.f32 %v1037_v15, %v331_v1  ;;  %v351_v12 = vsub.f32 %v1047_v20, %v335_v2 }
  0xe5   :  { %v489_v18 = vmul.f32 %v703_v30, %v488_v61  ;;  %vm493_vm14 = vcmp.eq.f32.partialorder %v1070_v58, 0.0  ;;  %v536_v28 = vsub.f32 1.5, %v535_v3  ;;  %v403_v14 = vmul.f32 0.5, %v402_v4 }
  0xe6   :  { %710 = vrsqrt.f32 %v1135_v5  ;;  %v494_v52 = vand.u32 2147483648, %v1070_v58  ;;  %v449_v17 = vmul.f32 %v709_v13, %v1114_v39  ;;  %v339_v21 = vmul.f32 2.0, %v213_v6 }
  0xe7   :  { %v490_v16 = vmul.f32 %v489_v18, %v1070_v58  ;;  %v537_v22 = vmul.f32 %v705_v41, %v536_v28  ;;  %v404_v53 = vsub.f32 1.5, %v403_v14  ;;  %v1144_v23 = vmax.f32 %v358_v7, 1e-12  ;;  %v307_v41 = vpop.permute.xlu0 %306 }
  0xe8   :  { %v1146_v15 = vmax.f32 %v347_v8, 1e-12  ;;  %vm539_vm15 = vcmp.eq.f32.partialorder %v1074_v62, inf  ;;  %v450_v25 = vmul.f32 %v709_v13, %v449_v17  ;;  %v1152_v26 = vmax.f32 %v351_v12, 1e-12 }
  0xe9   :  { %v492_v20 = vsel %vm491_vm13, %v1070_v58, %v490_v16  ;;  %v538_v29 = vmul.f32 %v537_v22, %v1074_v62  ;;  %v405_v30 = vmul.f32 %v707_v51, %v404_v53  ;;  %712 = vrsqrt.f32 %v1144_v23 }
  0xea   :  { %v495_v27 = vsel %vm493_vm14, %v494_v52, %v492_v20  ;;  %vm541_vm0 = vcmp.eq.f32.partialorder %v1074_v62, 0.0  ;;  %v542_v31 = vand.u32 2147483648, %v1074_v62  ;;  %vm407_vm1 = vcmp.eq.f32.partialorder %v1076_v63, inf }
  0xeb   :  { %577 = vst [vmem:[#allocation2 + $0x48] sm:$0xff] %v495_v27  ;;  %v451_v32 = vmul.f32 0.5, %v450_v25  ;;  %v540_v33 = vsel %vm539_vm15, %v1074_v62, %v538_v29  ;;  %v406_v34 = vmul.f32 %v405_v30, %v1076_v63  ;;  %714 = vrsqrt.f32 %v1146_v15 }
  0xec   :  { %v711_v19 = vpop.eup %710  ;;  %v355_v58 = vsub.f32 %v1052_v24, %v339_v21  ;;  %v543_v35 = vsel %vm541_vm0, %v542_v31, %v540_v33  ;;  %v410_v36 = vand.u32 2147483648, %v1076_v63  ;;  %vm409_vm2 = vcmp.eq.f32.partialorder %v1076_v63, 0.0 }
  0xed   :  { %v452_v37 = vsub.f32 1.5, %v451_v32  ;;  %v497_v38 = vmul.f32 %v711_v19, %v1135_v5  ;;  %581 = vst [vmem:[#allocation2 + $0x68] sm:$0xff] %v543_v35  ;;  %v408_v43 = vsel %vm407_vm1, %v1076_v63, %v406_v34  ;;  %716 = vrsqrt.f32 %v1152_v26 }
  0xee   :  { %v411_v62 = vsel %vm409_vm2, %v410_v36, %v408_v43  ;;  %v1170_v24 = vmax.f32 %v355_v58, 1e-12  ;;  %v343_v46 = vmul.f32 2.0, %v225_v40  ;;  %v327_v47 = vadd.f32 %v1014_v42, %v307_v41 }
  0xef   :  { %v453_v44 = vmul.f32 %v709_v13, %v452_v37  ;;  %v498_v45 = vmul.f32 %v711_v19, %v497_v38  ;;  %v713_v9 = vpop.eup %712  ;;  %570 = vst [vmem:[#allocation2 + $0x10] sm:$0xff] %v411_v62  ;;  %vm455_vm3 = vcmp.eq.f32.partialorder %v1114_v39, inf  ;;  %vm457_vm4 = vcmp.eq.f32.partialorder %v1114_v39, 0.0 }
  0xf0   :  { %v545_v10 = vmul.f32 %v713_v9, %v1144_v23  ;;  %v458_v63 = vand.u32 2147483648, %v1114_v39  ;;  %718 = vrsqrt.f32 %v1170_v24  ;;  %v359_v57 = vsub.f32 %v327_v47, %v343_v46 }
  0xf1   :  { %v454_v48 = vmul.f32 %v453_v44, %v1114_v39  ;;  %v499_v49 = vmul.f32 0.5, %v498_v45  ;;  %v715_v50 = vpop.eup %714  ;;  %vm503_vm5 = vcmp.eq.f32.partialorder %v1135_v5, inf  ;;  %vm505_vm6 = vcmp.eq.f32.partialorder %v1135_v5, 0.0 }
  0xf2   :  { %v546_v55 = vmul.f32 %v713_v9, %v545_v10  ;;  %v413_v42 = vmul.f32 %v715_v50, %v1146_v15  ;;  %v1182_v1 = vmax.f32 %v359_v57, 1e-12  ;;  %v506_v18 = vand.u32 2147483648, %v1135_v5 }
  0xf3   :  { %v456_v51 = vsel %vm455_vm3, %v1114_v39, %v454_v48  ;;  %v500_v54 = vsub.f32 1.5, %v499_v49  ;;  %v717_v11 = vpop.eup %716  ;;  %vm551_vm7 = vcmp.eq.f32.partialorder %v1144_v23, inf  ;;  %v554_v21 = vand.u32 2147483648, %v1144_v23 }
  0xf4   :  { %v459_v56 = vsel %vm457_vm4, %v458_v63, %v456_v51  ;;  %v547_v60 = vmul.f32 0.5, %v546_v55  ;;  %v414_v61 = vmul.f32 %v715_v50, %v413_v42  ;;  %v461_v0 = vmul.f32 %v717_v11, %v1152_v26 }
  0xf5   :  { %574 = vst [vmem:[#allocation2 + $0x30] sm:$0xff] %v459_v56  ;;  %v501_v59 = vmul.f32 %v711_v19, %v500_v54  ;;  %720 = vrsqrt.f32 %v1182_v1  ;;  %vm553_vm8 = vcmp.eq.f32.partialorder %v1144_v23, 0.0  ;;  %vm419_vm9 = vcmp.eq.f32.partialorder %v1146_v15, inf }
  0xf6   :  { %v548_v3 = vsub.f32 1.5, %v547_v60  ;;  %v415_v4 = vmul.f32 0.5, %v414_v61  ;;  %v462_v39 = vmul.f32 %v717_v11, %v461_v0  ;;  %v719_v6 = vpop.eup %718  ;;  %v422_v29 = vand.u32 2147483648, %v1146_v15 }
  0xf7   :  { %v502_v2 = vmul.f32 %v501_v59, %v1135_v5  ;;  %v509_v14 = vmul.f32 %v719_v6, %v1170_v24  ;;  %vm421_vm10 = vcmp.eq.f32.partialorder %v1146_v15, 0.0  ;;  %vm467_vm11 = vcmp.eq.f32.partialorder %v1152_v26, inf }
  0xf8   :  { %v549_v8 = vmul.f32 %v713_v9, %v548_v3  ;;  %v416_v12 = vsub.f32 1.5, %v415_v4  ;;  %v463_v13 = vmul.f32 0.5, %v462_v39  ;;  %v470_v33 = vand.u32 2147483648, %v1152_v26 }
  0xf9   :  { %v504_v7 = vsel %vm503_vm5, %v1135_v5, %v502_v2  ;;  %v510_v22 = vmul.f32 %v719_v6, %v509_v14  ;;  %vm469_vm12 = vcmp.eq.f32.partialorder %v1152_v26, 0.0  ;;  %vm515_vm13 = vcmp.eq.f32.partialorder %v1170_v24, inf }
  0xfa   :  { %v507_v28 = vsel %vm505_vm6, %v506_v18, %v504_v7  ;;  %v550_v16 = vmul.f32 %v549_v8, %v1144_v23  ;;  %v417_v52 = vmul.f32 %v715_v50, %v416_v12  ;;  %v464_v17 = vsub.f32 1.5, %v463_v13 }
  0xfb   :  { %578 = vst [vmem:[#allocation2 + $0x50] sm:$0xff] %v507_v28  ;;  %v721_v25 = vpop.eup %720  ;;  %v511_v30 = vmul.f32 0.5, %v510_v22  ;;  %v518_v40 = vand.u32 2147483648, %v1170_v24  ;;  %vm517_vm14 = vcmp.eq.f32.partialorder %v1170_v24, 0.0  ;;  %vm563_vm15 = vcmp.eq.f32.partialorder %v1182_v1, inf }
  0xfc   :  { %v552_v53 = vsel %vm551_vm7, %v1144_v23, %v550_v16  ;;  %v418_v5 = vmul.f32 %v417_v52, %v1146_v15  ;;  %v465_v20 = vmul.f32 %v717_v11, %v464_v17  ;;  %v557_v19 = vmul.f32 %v721_v25, %v1182_v1 }
  0xfd   :  { %v555_v27 = vsel %vm553_vm8, %v554_v21, %v552_v53  ;;  %v512_v34 = vsub.f32 1.5, %v511_v30  ;;  %v566_v45 = vand.u32 2147483648, %v1182_v1  ;;  %vm565_vm0 = vcmp.eq.f32.partialorder %v1182_v1, 0.0 }
  0xfe   :  { %582 = vst [vmem:[#allocation2 + $0x70] sm:$0xff] %v555_v27  ;;  %v420_v31 = vsel %vm419_vm9, %v1146_v15, %v418_v5  ;;  %v466_v32 = vmul.f32 %v465_v20, %v1152_v26  ;;  %v558_v35 = vmul.f32 %v721_v25, %v557_v19 }
  0xff   :  { %v423_v23 = vsel %vm421_vm10, %v422_v29, %v420_v31  ;;  %v513_v37 = vmul.f32 %v719_v6, %v512_v34 }
 0x100   :  { %571 = vst [vmem:[#allocation2 + $0x18] sm:$0xff] %v423_v23  ;;  %v468_v58 = vsel %vm467_vm11, %v1152_v26, %v466_v32  ;;  %v559_v15 = vmul.f32 0.5, %v558_v35 }
 0x101   :  { %v471_v36 = vsel %vm469_vm12, %v470_v33, %v468_v58  ;;  %v514_v38 = vmul.f32 %v513_v37, %v1170_v24 }
 0x102   :  { %575 = vst [vmem:[#allocation2 + $0x38] sm:$0xff] %v471_v36  ;;  %v560_v41 = vsub.f32 1.5, %v559_v15 }
 0x103   :  { %v516_v43 = vsel %vm515_vm13, %v1170_v24, %v514_v38 }
 0x104   :  { %v519_v62 = vsel %vm517_vm14, %v518_v40, %v516_v43  ;;  %v561_v44 = vmul.f32 %v721_v25, %v560_v41 }
 0x105   :  { %579 = vst [vmem:[#allocation2 + $0x58] sm:$0xff] %v519_v62 }
 0x106   :  { %v562_v26 = vmul.f32 %v561_v44, %v1182_v1 }
 0x108   :  { %v564_v9 = vsel %vm563_vm15, %v1182_v1, %v562_v26 }
 0x109   :  { %v567_v24 = vsel %vm565_vm0, %v566_v45, %v564_v9 }
 0x10a   :  { %583 = vst [vmem:[#allocation2 + $0x78] sm:$0xff] %v567_v24 }
 0x10b   :  { %596 = dma.vmem_to_hbm [thread:$0]  %s589_s22, 2048, %s591_s25, [#allocation3], %s750_s26, %s750_s26, %s751_s27  }
 0x10c   :  { %746 = dma.done.wait [#allocation3], 2048  }
 0x10d   :  { %747 = vsyncadd [#allocation3], 4294965248 }
 0x10e   :  { %601 = vsyncpa [#allocation3], 1 }

</bundles_post_ra>
